<compile_context>
chip_gen: v7x
topology: tpu7x:2x2x1
jax: 0.10.0
libtpu: 0.0.40
codegen_flags: <defaults>
</compile_context>

<pallas_src>
import functools

import jax
import jax.numpy as jnp
from jax.experimental import pallas as pl
from jax.experimental.pallas import tpu as pltpu


def tokenlearner_kernel(x_ref, gamma_ref, beta_ref, w1_ref, b1_ref,
                        w2_ref, b2_ref, wc_ref, out_ref, *scratch,
                        bt, n, c, s, num_groups, grouped, approx):
    """One grid step processes `bt` batch elements.

    x_ref:   (bt*n, c) slab of inputs (batch folded into rows).
    wc_ref:  (c, c) dense block-diagonal weight, or (G, c//G, c//G) when `grouped`.
    out_ref: (bt, s, c).
    scratch: (feat_scratch,) of shape (bt*n, c) when `grouped`, else empty.
    """
    gelu = functools.partial(jax.nn.gelu, approximate=approx)
    mm_dtype = w1_ref.dtype          # f32, or bf16 when bf16_matmuls=True (accumulation stays f32)

    x2 = x_ref[...]                                            # (bt*n, c) f32

    # ---- LayerNorm over channels (eps = 1e-5, nn.LayerNorm default) + affine.
    mean = jnp.mean(x2, axis=-1, keepdims=True)
    var = jnp.mean((x2 - mean) ** 2, axis=-1, keepdims=True)
    xn = (x2 - mean) * jax.lax.rsqrt(var + 1e-5)
    xn = xn * gamma_ref[...] + beta_ref[...]

    # ---- attention_maps: Linear(C->C) -> GELU -> Linear(C->S) on the whole slab (MXU).
    h = jnp.dot(xn.astype(mm_dtype), w1_ref[...],
                preferred_element_type=jnp.float32) + b1_ref[...]
    h = gelu(h)
    attn2 = jnp.dot(h.astype(mm_dtype), w2_ref[...],
                    preferred_element_type=jnp.float32) + b2_ref[...]     # (bt*n, s)

    # ---- feat path: grouped kernel-size-1 Conv1d (== block-diagonal linear) + GELU.
    if grouped:
        # Only taken when Cg % 128 == 0: per-group results go straight into a VMEM scratch at
        # static lane-aligned offsets (no jnp.concatenate copy pass).
        feat_scratch, = scratch
        cg = c // num_groups
        for g in range(num_groups):
            lo = g * cg
            feat_scratch[:, lo:lo + cg] = gelu(
                jnp.dot(x2[:, lo:lo + cg].astype(mm_dtype), wc_ref[g],
                        preferred_element_type=jnp.float32))
        feat2 = feat_scratch[...]
    else:
        feat2 = gelu(jnp.dot(x2.astype(mm_dtype), wc_ref[...],
                             preferred_element_type=jnp.float32))         # (bt*n, c)

    # ---- epilogue: softmax over N per (batch, summary token), then (S,N)@(N,C) contraction.
    if n % 8 == 0 or bt == 1:
        # Vectorized over the whole batch tile.  The (bt*n, *) -> (bt, n, *) split is a clean
        # sublane split when n % 8 == 0, or just a leading-unit-dim add when bt == 1.
        attn3 = attn2.reshape(bt, n, s)                        # (bt, n, s)
        feat3 = feat2.reshape(bt, n, c)                        # (bt, n, c)
        m = jnp.max(attn3, axis=1, keepdims=True)              # (bt, 1, s)
        e = jnp.exp(attn3 - m)
        inv = pl.reciprocal(jnp.sum(e, axis=1, keepdims=True), approx=approx)
        p = e * inv                                            # softmax over N
        # out[b, s, c] = sum_n p[b, n, s] * feat[b, n, c]  ==  einsum('...si,...id->...sd')
        o = jnp.einsum("bns,bnc->bsc", p, feat3,
                       preferred_element_type=jnp.float32)     # (bt, s, c)
        out_ref[...] = o.astype(out_ref.dtype)                 # single full-block store
    else:
        # TODO(synk): correctness fallback only for N % 8 != 0 (non-sublane-aligned batch
        # split); slower unrolled per-batch epilogue, never hit at the demo shapes.
        for b in range(bt):
            a_b = attn2[b * n:(b + 1) * n, :]
            f_b = feat2[b * n:(b + 1) * n, :]
            a_b = a_b - jnp.max(a_b, axis=0, keepdims=True)
            e = jnp.exp(a_b)
            inv = pl.reciprocal(jnp.sum(e, axis=0, keepdims=True), approx=approx)
            p_b = e * inv
            o_b = jax.lax.dot_general(p_b, f_b,
                                      dimension_numbers=(((0,), (0,)), ((), ())),
                                      preferred_element_type=jnp.float32)
            out_ref[b] = o_b.astype(out_ref.dtype)
    # Dropout is identity in eval mode.


def _dense_conv_weight(wc_group):
    """Fold (G, Cg_in, Cg_out) grouped 1x1-conv weights into a dense block-diagonal
    (C, C) matrix applied as feat = x @ Wc in (N, C) layout."""
    g = wc_group.shape[0]
    return jax.scipy.linalg.block_diag(*[wc_group[i] for i in range(g)])


def _tensorcores_per_chip():
    """How many TensorCores a single pallas_call can shard a 'parallel' grid axis across
    (megacore chips such as v7x -> 2; single-core v5e/v6e -> 1).  Best-effort and safe:
    falls back to the device-kind string, and to 2 (harmless) if unknown."""
    try:
        info = pltpu.get_tpu_info()
        for attr in ("num_cores", "cores_per_chip", "num_tensorcores"):
            val = getattr(info, attr, None)
            if isinstance(val, int) and val > 0:
                return val
    except Exception:
        pass
    try:
        kind = jax.devices()[0].device_kind.lower()
    except Exception:
        return 1
    single_core = any(tag in kind for tag in
                      ("v5 lite", "v5e", "v5lite", "v6 lite", "v6e", "v6lite"))
    return 1 if single_core else 2


def _pick_batch_tile(B, N, C, S, n_cores):
    """Batch elements per grid step.

    Targets ~2048 rows of the (bt*N, C) slab per step (the ~0.35 us per-step pipeline
    overhead dominates at these FLOP counts), clipped by a conservative VMEM budget,
    split into >= 2 grid steps only when a second TensorCore exists to shard onto,
    forced to divide B, and forced to satisfy the (8,128) block-shape rule.
    """
    target_rows = 2048
    bt = min(B, max(1, target_rows // max(N, 1)))

    # VMEM guard: double-buffered x slab + out block + (double-buffered) weights must stay
    # well under the smallest scoped-VMEM default (16 MiB on v5e).
    weight_bytes = (2 * C * C + C * S + 3 * C + 2 * S) * 4

    def step_bytes(t):
        return 2 * (t * N * C + t * S * C) * 4 + 2 * weight_bytes

    budget = 12 * 1024 * 1024
    while bt > 1 and step_bytes(bt) > budget:
        bt -= 1

    # Only force >= 2 grid steps when there is a second TensorCore (v7x megacore);
    # on single-TC v5e/v6e one fat step avoids doubling the fixed per-step overhead.
    if n_cores >= 2 and B >= 2:
        bt = min(bt, max(1, B // 2))

    bt = max(bt, 1)
    while B % bt:
        bt -= 1

    # (8,128) rule: second-to-last block dim (bt*N) must be 8-aligned unless the block
    # spans the whole array (bt == B).
    if (bt * N) % 8 != 0 and bt != B:
        cands = [t for t in range(bt + 1, B + 1) if B % t == 0 and (t * N) % 8 == 0]
        bt = cands[0] if cands else B
    return bt


def token_learner_v11(x, params, summerize_num_tokens, num_groups, *,
                      batch_tile=None, approx_transcendentals=True,
                      bf16_matmuls=False):
    """x: (B, N, C) float32.  Returns (B, S, C) float32.

    approx_transcendentals=True (production default): tanh-GELU + approximate softmax
    reciprocal run on the EUP instead of the saturated VALU slot.  Set False for
    bit-matching against exact-erf nn.GELU / exact softmax semantics.
    bf16_matmuls=True casts only the MXU operands to bf16 (f32 accumulation and all
    elementwise math stay f32); requires a looser test tolerance.
    """
    B, N, C = x.shape
    S = summerize_num_tokens
    G = num_groups
    Cg = C // G

    n_cores = _tensorcores_per_chip()
    bt = _pick_batch_tile(B, N, C, S, n_cores) if batch_tile is None else batch_tile
    assert B % bt == 0, (B, bt)
    grid = (B // bt,)

    mm_dtype = jnp.bfloat16 if bf16_matmuls else jnp.float32

    # Weight BlockSpecs never change block index; at large C single-buffer them so
    # double-buffering does not burn VMEM (matters on v7x's 64 MiB physical VMEM).
    weight_mode = dict(pipeline_mode=pl.Buffered(1)) if C >= 1024 else {}

    # Grouped matmul path only when each group's channel slice is lane-aligned (large C);
    # at small C a dense block-diagonal matmul keeps the MXU contraction/lane dims fuller.
    grouped = (G > 1) and (Cg % 128 == 0)
    if grouped:
        wc = params["wc_group"].astype(mm_dtype)                     # (G, Cg, Cg)
        wc_spec = pl.BlockSpec((G, Cg, Cg), lambda i: (0, 0, 0), **weight_mode)
        scratch_shapes = [pltpu.VMEM((bt * N, C), jnp.float32)]
    else:
        wc = _dense_conv_weight(params["wc_group"]).astype(mm_dtype)  # (C, C)
        wc_spec = pl.BlockSpec((C, C), lambda i: (0, 0), **weight_mode)
        scratch_shapes = []

    # Batch is folded into rows outside the kernel (free row-major reshape) so the kernel
    # block is a 2D (bt*N, C) slab.
    x2 = x.reshape(B * N, C)

    kernel = functools.partial(
        tokenlearner_kernel, bt=bt, n=N, c=C, s=S,
        num_groups=G, grouped=grouped, approx=approx_transcendentals)

    # Raise the scoped-VMEM limit only if the estimated per-step footprint needs it
    # (never at the demo sizes).
    est_bytes = (2 * (bt * N * C + bt * S * C) * 4
                 + (1 if C >= 1024 else 2) * (2 * C * C + C * S + 3 * C + 2 * S) * 4
                 + (bt * N * C * 4 if grouped else 0))
    compiler_kwargs = dict(dimension_semantics=("parallel",))
    if est_bytes > 16 * 1024 * 1024:
        compiler_kwargs["vmem_limit_bytes"] = min(2 * est_bytes, 64 * 1024 * 1024)

    return pl.pallas_call(
        kernel,
        out_shape=jax.ShapeDtypeStruct((B, S, C), jnp.float32),
        grid=grid,
        in_specs=[
            pl.BlockSpec((bt * N, C), lambda i: (i, 0)),               # x slab: bt batches/step
            pl.BlockSpec((1, C), lambda i: (0, 0)),                    # LayerNorm gamma
            pl.BlockSpec((1, C), lambda i: (0, 0)),                    # LayerNorm beta
            pl.BlockSpec((C, C), lambda i: (0, 0), **weight_mode),     # w1 (in, out)
            pl.BlockSpec((1, C), lambda i: (0, 0)),                    # b1
            pl.BlockSpec((C, S), lambda i: (0, 0), **weight_mode),     # w2 (in, out)
            pl.BlockSpec((1, S), lambda i: (0, 0)),                    # b2
            wc_spec,                                                   # grouped-conv weight
        ],
        out_specs=pl.BlockSpec((bt, S, C), lambda i: (i, 0, 0)),
        scratch_shapes=scratch_shapes,
        compiler_params=pltpu.CompilerParams(**compiler_kwargs),
    )(x2, params["ln_gamma"], params["ln_beta"],
      params["w1"].astype(mm_dtype), params["b1"],
      params["w2"].astype(mm_dtype), params["b2"], wc)


def init_params(key, in_channels, summerize_num_tokens, num_groups):
    """Deterministic synthetic parameters with the same shapes as the PyTorch module."""
    C, S, G = in_channels, summerize_num_tokens, num_groups
    Cg = C // G
    ks = jax.random.split(key, 7)

    ln_gamma = 1.0 + 0.1 * jax.random.normal(ks[0], (1, C), jnp.float32)
    ln_beta = 0.1 * jax.random.normal(ks[1], (1, C), jnp.float32)

    # Linear layers: PyTorch stores (out, in) and computes x @ W.T + b; we store (in, out).
    w1 = 0.2 * jax.random.normal(ks[2], (C, C), jnp.float32)
    b1 = 0.1 * jax.random.normal(ks[3], (1, C), jnp.float32)
    w2 = 0.2 * jax.random.normal(ks[4], (C, S), jnp.float32)
    b2 = 0.1 * jax.random.normal(ks[5], (1, S), jnp.float32)

    # Grouped Conv1d(k=1, bias=False): torch weight is (C_out, Cg_in, 1). We keep it as
    # per-group (in, out) matrices: wc_group[g, i, o] == torch_w[g*Cg + o, i, 0].
    wc_group = 0.2 * jax.random.normal(ks[6], (G, Cg, Cg), jnp.float32)

    return {"ln_gamma": ln_gamma, "ln_beta": ln_beta,
            "w1": w1, "b1": b1, "w2": w2, "b2": b2,
            "wc_group": wc_group}


def reference_forward(x, params):
    """Pure-JAX mirror of the PyTorch forward (eval mode)."""
    gamma, beta = params["ln_gamma"], params["ln_beta"]
    mean = jnp.mean(x, axis=-1, keepdims=True)
    var = jnp.mean((x - mean) ** 2, axis=-1, keepdims=True)
    xn = (x - mean) / jnp.sqrt(var + 1e-5) * gamma + beta
    h = jax.nn.gelu(xn @ params["w1"] + params["b1"], approximate=False)
    attn = h @ params["w2"] + params["b2"]                     # (B, N, S)
    attn = jax.nn.softmax(jnp.swapaxes(attn, 1, 2), axis=-1)   # (B, S, N)
    wc = _dense_conv_weight(params["wc_group"])
    feat = jax.nn.gelu(x @ wc, approximate=False)              # (B, N, C)
    return jnp.einsum("bsn,bnc->bsc", attn, feat)


if __name__ == "__main__":
    B, N, C = 8, 16, 32          # batch, seq_len (tokens), in_channels
    S, G = 8, 4                  # summerize_num_tokens, num_groups
    dropout_rate = 0.1           # nn.Dropout is identity at inference

    key = jax.random.PRNGKey(0)
    k_x, k_p = jax.random.split(key)
    x = jax.random.normal(k_x, (B, N, C), jnp.float32)
    params = init_params(k_p, C, S, G)

    ref = reference_forward(x, params)

    # Production default: EUP-routed tanh-GELU + approximate softmax reciprocal.
    out = jax.block_until_ready(token_learner_v11(x, params, S, G))
    assert out.shape == (B, S, C), out.shape
    assert jnp.allclose(out, ref, atol=5e-2, rtol=5e-2), \
        float(jnp.max(jnp.abs(out - ref)))

    # Exact path (matches nn.GELU(erf) / exact softmax semantics bit-for-bit-ish).
    out_exact = jax.block_until_ready(
        token_learner_v11(x, params, S, G, approx_transcendentals=False))
    assert out_exact.shape == (B, S, C), out_exact.shape
    assert jnp.allclose(out_exact, ref, atol=1e-4, rtol=1e-4), \
        float(jnp.max(jnp.abs(out_exact - ref)))

    print("KERNEL_OK")
</pallas_src>

<mosaic_0001>
module attributes {stable_mosaic.version = 11 : i64} {
  func.func @tokenlearner_kernel(%arg0: i32, %arg1: memref<64x32xf32, #tpu.memory_space<vmem>>, %arg2: memref<1x32xf32, #tpu.memory_space<vmem>>, %arg3: memref<1x32xf32, #tpu.memory_space<vmem>>, %arg4: memref<32x32xf32, #tpu.memory_space<vmem>>, %arg5: memref<1x32xf32, #tpu.memory_space<vmem>>, %arg6: memref<32x8xf32, #tpu.memory_space<vmem>>, %arg7: memref<1x8xf32, #tpu.memory_space<vmem>>, %arg8: memref<32x32xf32, #tpu.memory_space<vmem>>, %arg9: memref<4x8x32xf32, #tpu.memory_space<vmem>>) attributes {dimension_semantics = [#tpu.dimension_semantics<parallel>], iteration_bounds = array<i64: 2>, scalar_prefetch = 0 : i64, scratch_operands = 0 : i64, tpu.core_type = #tpu.core_type<tc>, window_params = [{transform_indices = @transform_0, window_bounds = array<i64: 64, 32>}, {pipeline_mode = #tpu.pipeline_mode<synchronous>, transform_indices = @transform_1, window_bounds = array<i64: 1, 32>}, {pipeline_mode = #tpu.pipeline_mode<synchronous>, transform_indices = @transform_2, window_bounds = array<i64: 1, 32>}, {pipeline_mode = #tpu.pipeline_mode<synchronous>, transform_indices = @transform_3, window_bounds = array<i64: 32, 32>}, {pipeline_mode = #tpu.pipeline_mode<synchronous>, transform_indices = @transform_4, window_bounds = array<i64: 1, 32>}, {pipeline_mode = #tpu.pipeline_mode<synchronous>, transform_indices = @transform_5, window_bounds = array<i64: 32, 8>}, {pipeline_mode = #tpu.pipeline_mode<synchronous>, transform_indices = @transform_6, window_bounds = array<i64: 1, 8>}, {pipeline_mode = #tpu.pipeline_mode<synchronous>, transform_indices = @transform_7, window_bounds = array<i64: 32, 32>}, {transform_indices = @transform_8, window_bounds = array<i64: 4, 8, 32>}]} {
    %c0 = arith.constant 0 : index
    %c0_0 = arith.constant 0 : index
    %0 = vector.load %arg1[%c0, %c0_0] : memref<64x32xf32, #tpu.memory_space<vmem>>, vector<64x32xf32>
    %cst = arith.constant dense<0.000000e+00> : vector<64xf32>
    %1 = vector.multi_reduction <add>, %0, %cst [1] : vector<64x32xf32> to vector<64xf32>
    %2 = vector.shape_cast %1 : vector<64xf32> to vector<64x1xf32>
    %cst_1 = arith.constant 3.200000e+01 : f32
    %3 = vector.broadcast %cst_1 : f32 to vector<64x1xf32>
    %4 = arith.divf %2, %3 : vector<64x1xf32>
    %5 = vector.broadcast %4 : vector<64x1xf32> to vector<64x32xf32>
    %6 = arith.subf %0, %5 : vector<64x32xf32>
    %7 = arith.mulf %6, %6 : vector<64x32xf32>
    %cst_2 = arith.constant dense<0.000000e+00> : vector<64xf32>
    %8 = vector.multi_reduction <add>, %7, %cst_2 [1] : vector<64x32xf32> to vector<64xf32>
    %9 = vector.shape_cast %8 : vector<64xf32> to vector<64x1xf32>
    %cst_3 = arith.constant 3.200000e+01 : f32
    %10 = vector.broadcast %cst_3 : f32 to vector<64x1xf32>
    %11 = arith.divf %9, %10 : vector<64x1xf32>
    %12 = vector.broadcast %4 : vector<64x1xf32> to vector<64x32xf32>
    %13 = arith.subf %0, %12 : vector<64x32xf32>
    %cst_4 = arith.constant 9.99999974E-6 : f32
    %14 = vector.broadcast %cst_4 : f32 to vector<64x1xf32>
    %15 = arith.addf %11, %14 : vector<64x1xf32>
    %16 = math.rsqrt %15 : vector<64x1xf32>
    %17 = vector.broadcast %16 : vector<64x1xf32> to vector<64x32xf32>
    %18 = arith.mulf %13, %17 : vector<64x32xf32>
    %c0_5 = arith.constant 0 : index
    %c0_6 = arith.constant 0 : index
    %19 = vector.load %arg2[%c0_5, %c0_6] : memref<1x32xf32, #tpu.memory_space<vmem>>, vector<1x32xf32>
    %20 = vector.broadcast %19 : vector<1x32xf32> to vector<64x32xf32>
    %21 = arith.mulf %18, %20 : vector<64x32xf32>
    %c0_7 = arith.constant 0 : index
    %c0_8 = arith.constant 0 : index
    %22 = vector.load %arg3[%c0_7, %c0_8] : memref<1x32xf32, #tpu.memory_space<vmem>>, vector<1x32xf32>
    %23 = vector.broadcast %22 : vector<1x32xf32> to vector<64x32xf32>
    %24 = arith.addf %21, %23 : vector<64x32xf32>
    %c0_9 = arith.constant 0 : index
    %c0_10 = arith.constant 0 : index
    %25 = vector.load %arg4[%c0_9, %c0_10] : memref<32x32xf32, #tpu.memory_space<vmem>>, vector<32x32xf32>
    %cst_11 = arith.constant dense<0.000000e+00> : vector<64x32xf32>
    %26 = tpu.matmul %24, %25, %cst_11 {dimension_numbers = #tpu.dot_dimension_numbers<[1], [0], [0], [1], [0, 0, 1, 1], [], []>} : vector<64x32xf32>, vector<32x32xf32>, vector<64x32xf32> -> vector<64x32xf32>
    %c0_12 = arith.constant 0 : index
    %c0_13 = arith.constant 0 : index
    %27 = vector.load %arg5[%c0_12, %c0_13] : memref<1x32xf32, #tpu.memory_space<vmem>>, vector<1x32xf32>
    %28 = vector.broadcast %27 : vector<1x32xf32> to vector<64x32xf32>
    %29 = arith.addf %26, %28 : vector<64x32xf32>
    %30 = arith.mulf %29, %29 : vector<64x32xf32>
    %31 = arith.mulf %29, %30 : vector<64x32xf32>
    %cst_14 = arith.constant 4.471500e-02 : f32
    %32 = vector.broadcast %cst_14 : f32 to vector<64x32xf32>
    %33 = arith.mulf %32, %31 : vector<64x32xf32>
    %34 = arith.addf %29, %33 : vector<64x32xf32>
    %cst_15 = arith.constant 0.797884583 : f32
    %35 = vector.broadcast %cst_15 : f32 to vector<64x32xf32>
    %36 = arith.mulf %35, %34 : vector<64x32xf32>
    %37 = math.tanh %36 : vector<64x32xf32>
    %cst_16 = arith.constant 1.000000e+00 : f32
    %38 = vector.broadcast %cst_16 : f32 to vector<64x32xf32>
    %39 = arith.addf %38, %37 : vector<64x32xf32>
    %cst_17 = arith.constant 5.000000e-01 : f32
    %40 = vector.broadcast %cst_17 : f32 to vector<64x32xf32>
    %41 = arith.mulf %40, %39 : vector<64x32xf32>
    %42 = arith.mulf %29, %41 : vector<64x32xf32>
    %c0_18 = arith.constant 0 : index
    %c0_19 = arith.constant 0 : index
    %43 = vector.load %arg6[%c0_18, %c0_19] : memref<32x8xf32, #tpu.memory_space<vmem>>, vector<32x8xf32>
    %cst_20 = arith.constant dense<0.000000e+00> : vector<64x8xf32>
    %44 = tpu.matmul %42, %43, %cst_20 {dimension_numbers = #tpu.dot_dimension_numbers<[1], [0], [0], [1], [0, 0, 1, 1], [], []>} : vector<64x32xf32>, vector<32x8xf32>, vector<64x8xf32> -> vector<64x8xf32>
    %c0_21 = arith.constant 0 : index
    %c0_22 = arith.constant 0 : index
    %45 = vector.load %arg7[%c0_21, %c0_22] : memref<1x8xf32, #tpu.memory_space<vmem>>, vector<1x8xf32>
    %46 = vector.broadcast %45 : vector<1x8xf32> to vector<64x8xf32>
    %47 = arith.addf %44, %46 : vector<64x8xf32>
    %c0_23 = arith.constant 0 : index
    %c0_24 = arith.constant 0 : index
    %48 = vector.load %arg8[%c0_23, %c0_24] : memref<32x32xf32, #tpu.memory_space<vmem>>, vector<32x32xf32>
    %cst_25 = arith.constant dense<0.000000e+00> : vector<64x32xf32>
    %49 = tpu.matmul %0, %48, %cst_25 {dimension_numbers = #tpu.dot_dimension_numbers<[1], [0], [0], [1], [0, 0, 1, 1], [], []>} : vector<64x32xf32>, vector<32x32xf32>, vector<64x32xf32> -> vector<64x32xf32>
    %50 = arith.mulf %49, %49 : vector<64x32xf32>
    %51 = arith.mulf %49, %50 : vector<64x32xf32>
    %cst_26 = arith.constant 4.471500e-02 : f32
    %52 = vector.broadcast %cst_26 : f32 to vector<64x32xf32>
    %53 = arith.mulf %52, %51 : vector<64x32xf32>
    %54 = arith.addf %49, %53 : vector<64x32xf32>
    %cst_27 = arith.constant 0.797884583 : f32
    %55 = vector.broadcast %cst_27 : f32 to vector<64x32xf32>
    %56 = arith.mulf %55, %54 : vector<64x32xf32>
    %57 = math.tanh %56 : vector<64x32xf32>
    %cst_28 = arith.constant 1.000000e+00 : f32
    %58 = vector.broadcast %cst_28 : f32 to vector<64x32xf32>
    %59 = arith.addf %58, %57 : vector<64x32xf32>
    %cst_29 = arith.constant 5.000000e-01 : f32
    %60 = vector.broadcast %cst_29 : f32 to vector<64x32xf32>
    %61 = arith.mulf %60, %59 : vector<64x32xf32>
    %62 = arith.mulf %49, %61 : vector<64x32xf32>
    %63 = vector.shape_cast %47 : vector<64x8xf32> to vector<4x16x8xf32>
    %64 = vector.shape_cast %62 : vector<64x32xf32> to vector<4x16x32xf32>
    %cst_30 = arith.constant dense<0xFF800000> : vector<4x8xf32>
    %65 = vector.multi_reduction <maximumf>, %63, %cst_30 [1] : vector<4x16x8xf32> to vector<4x8xf32>
    %66 = vector.shape_cast %65 : vector<4x8xf32> to vector<4x1x8xf32>
    %67 = vector.broadcast %66 : vector<4x1x8xf32> to vector<4x16x8xf32>
    %68 = arith.subf %63, %67 : vector<4x16x8xf32>
    %69 = math.exp %68 : vector<4x16x8xf32>
    %cst_31 = arith.constant dense<0.000000e+00> : vector<4x8xf32>
    %70 = vector.multi_reduction <add>, %69, %cst_31 [1] : vector<4x16x8xf32> to vector<4x8xf32>
    %71 = vector.shape_cast %70 : vector<4x8xf32> to vector<4x1x8xf32>
    %72 = tpu.reciprocal %71 {approx = true} : vector<4x1x8xf32> -> vector<4x1x8xf32>
    %73 = vector.broadcast %72 : vector<4x1x8xf32> to vector<4x16x8xf32>
    %74 = arith.mulf %69, %73 : vector<4x16x8xf32>
    "tpu.trace_start"() <{level = 10 : i32, message = "bns,bnc->bsc"}> : () -> ()
    %cst_32 = arith.constant dense<0.000000e+00> : vector<4x8x32xf32>
    %75 = tpu.matmul %74, %64, %cst_32 {dimension_numbers = #tpu.dot_dimension_numbers<[1], [1], [2], [2], [0, 0, 0, 2, 1, 2], [0], [0]>} : vector<4x16x8xf32>, vector<4x16x32xf32>, vector<4x8x32xf32> -> vector<4x8x32xf32>
    "tpu.trace_stop"() : () -> ()
    %c0_33 = arith.constant 0 : index
    %c0_34 = arith.constant 0 : index
    %c0_35 = arith.constant 0 : index
    %76 = vector.load %arg9[%c0_33, %c0_34, %c0_35] : memref<4x8x32xf32, #tpu.memory_space<vmem>>, vector<4x8x32xf32>
    tpu.vector_store %arg9[%c0_33, %c0_34, %c0_35], %75 {strides = array<i32>} : memref<4x8x32xf32, #tpu.memory_space<vmem>>, vector<4x8x32xf32>,
    return
  }
  func.func @transform_0(%arg0: i32) -> (i32, i32) {
    %c0_i32 = arith.constant 0 : i32
    %c0_i32_0 = arith.constant 0 : i32
    return %arg0, %c0_i32 : i32, i32
  }
  func.func @transform_1(%arg0: i32) -> (i32, i32) {
    %c0_i32 = arith.constant 0 : i32
    %c0_i32_0 = arith.constant 0 : i32
    %c0_i32_1 = arith.constant 0 : i32
    return %c0_i32, %c0_i32_0 : i32, i32
  }
  func.func @transform_2(%arg0: i32) -> (i32, i32) {
    %c0_i32 = arith.constant 0 : i32
    %c0_i32_0 = arith.constant 0 : i32
    %c0_i32_1 = arith.constant 0 : i32
    return %c0_i32, %c0_i32_0 : i32, i32
  }
  func.func @transform_3(%arg0: i32) -> (i32, i32) {
    %c0_i32 = arith.constant 0 : i32
    %c0_i32_0 = arith.constant 0 : i32
    %c0_i32_1 = arith.constant 0 : i32
    return %c0_i32, %c0_i32_0 : i32, i32
  }
  func.func @transform_4(%arg0: i32) -> (i32, i32) {
    %c0_i32 = arith.constant 0 : i32
    %c0_i32_0 = arith.constant 0 : i32
    %c0_i32_1 = arith.constant 0 : i32
    return %c0_i32, %c0_i32_0 : i32, i32
  }
  func.func @transform_5(%arg0: i32) -> (i32, i32) {
    %c0_i32 = arith.constant 0 : i32
    %c0_i32_0 = arith.constant 0 : i32
    %c0_i32_1 = arith.constant 0 : i32
    return %c0_i32, %c0_i32_0 : i32, i32
  }
  func.func @transform_6(%arg0: i32) -> (i32, i32) {
    %c0_i32 = arith.constant 0 : i32
    %c0_i32_0 = arith.constant 0 : i32
    %c0_i32_1 = arith.constant 0 : i32
    return %c0_i32, %c0_i32_0 : i32, i32
  }
  func.func @transform_7(%arg0: i32) -> (i32, i32) {
    %c0_i32 = arith.constant 0 : i32
    %c0_i32_0 = arith.constant 0 : i32
    %c0_i32_1 = arith.constant 0 : i32
    return %c0_i32, %c0_i32_0 : i32, i32
  }
  func.func @transform_8(%arg0: i32) -> (i32, i32, i32) {
    %c0_i32 = arith.constant 0 : i32
    %c0_i32_0 = arith.constant 0 : i32
    %c0_i32_1 = arith.constant 0 : i32
    return %arg0, %c0_i32, %c0_i32_0 : i32, i32, i32
  }
}

</mosaic_0001>

<bundles_post_ra>
// kernel: tpu_custom_call.1
= control target key start
LH: loop header
LB: loop body
LE: loop exit
PB: predicated region body
PF: predicated region fallthrough
CT: control target
= control target key end

     0   :  { %13 = vsyncpa [#allocation3], 0  ;;  %s2481_s0 = inlined_call_operand.vmem [shape: f32[128,32], index: 0, kind: input, shape index: {}]   ;;  %s2482_s1 = inlined_call_operand.vmem [shape: f32[1,32], index: 1, kind: input, shape index: {}]   ;;  %s2483_s2 = inlined_call_operand.vmem [shape: f32[1,32], index: 2, kind: input, shape index: {}]   ;;  %s2484_s3 = inlined_call_operand.vmem [shape: f32[32,32], index: 3, kind: input, shape index: {}]   ;;  %s2485_s4 = inlined_call_operand.vmem [shape: f32[1,32], index: 4, kind: input, shape index: {}]   ;;  %s2486_s5 = inlined_call_operand.vmem [shape: f32[32,8], index: 5, kind: input, shape index: {}]   ;;  %s2487_s6 = inlined_call_operand.vmem [shape: f32[1,8], index: 6, kind: input, shape index: {}]   ;;  %s2488_s7 = inlined_call_operand.vmem [shape: f32[32,32], index: 7, kind: input, shape index: {}]   ;;  %s2489_s8 = inlined_call_operand.hbm [shape: f32[8,8,32], index: 8, kind: output, shape index: {}]  }
   0x1   :  { %15 = vsyncpa [#allocation3 + $0x1], 0  ;;  %s2066_s27 = smov 0   ;;  %s2068_s28 = smov 0  }
   0x2   :  { %s2070_s29 = smov 0   ;;  %s2072_s30 = smov 0  }
   0x3 LB: > { %s2087_s9 = sadd.s32 4294967295, %s2013_s30   ;;  %s1618_s10 = sadd.s32 4294967294, %s2013_s30   ;;  %s2013_s30 = sphi %s2072_s30, %s2495_s30   ;;  %s2009_s29 = sphi %s2070_s29, %s2494_s29   ;;  %s2005_s28 = sphi %s2068_s28, %s2493_s28   ;;  %s2001_s27 = sphi %s2066_s27, %s2492_s27  }
   0x4   : > { %s2091_s11 = sadd.s32 1, %s2013_s30   ;;  %s201_s12 = sadd.s32 1, %s2009_s29 }
   0x5   : > { %s198_s13 = ssub.s32 %s2013_s30, %s2091_s11  ;;  %p211_p0 = scmp.ne.s32.totalorder %s2009_s29, %s2005_s28 }
   0x6   : > { %p199_p1 = scmp.eq.s32.totalorder %s198_s13, 0  ;;  %p212_p2 = scmp.eq.s32.totalorder %s2087_s9, 1 }
   0x7   : > { %p217_p3 = scmp.ne.s32.totalorder %s2005_s28, %s2001_s27  ;;  %p218_p4 = scmp.eq.s32.totalorder %s1618_s10, 1 }
   0x8   : > { %s2102_s14 = scalar_select %p199_p1, %s2009_s29, %s201_s12  }
   0x9   : > { %p2104_p5 = por %p212_p2, %p211_p0  ;;  %p2108_p6 = por %p218_p4, %p217_p3 }
   0xa   : > { %p1621_p7 = scmp.ge.s32.totalorder %s2013_s30, 1  ;;  %p266_p8 = scmp.lt.s32.totalorder %s2013_s30, 3 }
   0xc   : > { %p267_p9 = pnand %p1621_p7, %p266_p8 }
   0xd   : > { %s1623_s17 = sshll.u32 (!%p267_p9), %s2087_s9, 3  ;;  %vm315_vm0 = vcmask (!%p267_p9), 261120   ;;  %v451_v56 = vld [vmem:[%s2484_s3] sm:$0xff] (!%p267_p9)  ;;  %v452_v57 = vld [vmem:[%s2484_s3 + $0x8] sm:$0xff] (!%p267_p9)  ;;  %v453_v59 = vld [vmem:[%s2484_s3 + $0x10] sm:$0xff] (!%p267_p9)  ;;  %vm2016_vm1 = vmmov (!%p267_p9), 0  }
   0xe   : > { %270 = sbr.rel (%p267_p9) target bundleno = 1228 (0x4cc), region = 52  ;;  %p301_p10 = scmp.lt.s32.totalorder (!%p267_p9), %s1623_s17, 15  ;;  %v1799_v58 = vpack.c.bf16 (!%p267_p9), %v452_v57, %v451_v56  ;;  %v454_v60 = vld [vmem:[%s2484_s3 + $0x18] sm:$0xff] (!%p267_p9)  ;;  %vm1008_vm2 = vcmask (!%p267_p9), 64512   ;;  %vm1149_vm3 = vcmask (!%p267_p9), 130048  }
   0xf   : > { %v1803_v61 = vpack.c.bf16 (!%p267_p9), %v454_v60, %v453_v59  ;;  %s297_s12 = sand.u32 (!%p267_p9), 1, %s2005_s28   ;;  %s1662_s19 = sshll.u32 (!%p267_p9), %s2087_s9, 9 }
  0x10   : > { %1800 = vmatprep.subr.bf16.mxu0 (!%p267_p9), %v1799_v58  ;;  %s1622_s13 = sshll.u32 (!%p267_p9), %s297_s12, 5  ;;  %s2437_s22 = scalar_lea.hbm (!%p267_p9), %s2489_s8, %s1662_s19 }
  0x11   : > { %1802 = vmatpush3.bf16.msra.mxu0 (!%p267_p9), %v1799_v58  ;;  %s2440_s23 = scalar_lea.sflag (!%p267_p9), [#allocation3], %s297_s12  ;;  %s2018_s24 = smov (!%p267_p9), [#allocation2]  }
  0x12   : > { %1804 = vmatprep.subr.bf16.mxu0 (!%p267_p9), %v1803_v61  ;;  %s1955_s25 = sshll.u32 (!%p267_p9), %s2018_s24, 4  ;;  %s1956_s25 = int_to_ptr.vmem [resolvable:$false] %s1955_s25 }
  0x13   : > { %s1957_s26 = scalar_lea.vmem (!%p267_p9), %s1956_s25, 1024 }
  0x15   : > { %s2497_s17 = smov (!%p301_p10, %s1623_s17), 15  ;;  %1806 = vmatpush3.bf16.msra.mxu0 %v1803_v61 }
  0x16   : > { %s1624_s18 = sshll.u32 %s2497_s17, 3  ;;  %s299_s17 = scalar_lea.vmem [#allocation2], %s1622_s13 }
  0x17   : > { %s304_s21 = scalar_lea.vmem %s2481_s0, %s1624_s18  ;;  %s1556_s18 = sshll.u32 %s299_s17, 4  ;;  %s2432_s18 = int_to_ptr.vmem [resolvable:$true] %s1556_s18 }
  0x18   : > { %v2118_v0 = vld [vmem:[%s304_s21] sm:$0xff]  ;;  %v2120_v1 = vld [vmem:[%s304_s21 + $0x10] sm:$0xff]  ;;  %v2122_v2 = vld [vmem:[%s304_s21 + $0x8] sm:$0xff]  ;;  %s1951_s9 = scalar_lea.vmem %s2432_s18, 512  ;;  %p1958_p0 = scmp.lt.s32.totalorder %s2432_s18, %s1956_s25 }
  0x19   : > { %v316_v3 = vsel %vm315_vm0, %v2118_v0, 0.0  ;;  %v322_v4 = vsel %vm315_vm0, %v2120_v1, 0.0  ;;  %v2128_v5 = vld [vmem:[%s304_s21 + $0x18] sm:$0xff]  ;;  %v319_v6 = vsel %vm315_vm0, %v2122_v2, 0.0  ;;  %v2134_v8 = vld [vmem:[%s304_s21 + $0x20] sm:$0xff]  ;;  %v2136_v9 = vld [vmem:[%s304_s21 + $0x28] sm:$0xff]  ;;  %p1952_p11 = scmp.ne.s32.totalorder %s2432_s18, %s1951_s9  ;;  %p1959_p1 = scmp.lt.s32.totalorder %s1957_s26, %s1951_s9 }
  0x1a   : > { %317 = vadd.xlane.f32.xlu0 %v316_v3  ;;  %323 = vadd.xlane.f32.xlu1 %v322_v4  ;;  %v325_v7 = vsel %vm315_vm0, %v2128_v5, 0.0  ;;  %v328_v10 = vsel %vm315_vm0, %v2134_v8, 0.0  ;;  %v331_v11 = vsel %vm315_vm0, %v2136_v9, 0.0  ;;  %v2142_v12 = vld [vmem:[%s304_s21 + $0x30] sm:$0xff]  ;;  %v2144_v13 = vld [vmem:[%s304_s21 + $0x38] sm:$0xff] }
  0x1b   : > { %v334_v14 = vsel %vm315_vm0, %v2142_v12, 0.0  ;;  %v337_v15 = vsel %vm315_vm0, %v2144_v13, 0.0  ;;  %p1953_p12 = pnand %p1952_p11, %p2104_p5  ;;  %p1960_p2 = por %p1959_p1, %p1958_p0 }
  0x1d   : > { %p1954_p13 = pneg %p1953_p12 }
  0x1e   : > { %320 = vadd.xlane.f32.xlu0 %v319_v6  ;;  %326 = vadd.xlane.f32.xlu1 %v325_v7 }
  0x1f   : > { %p1961_p3 = pnand %p1960_p2, %p1954_p13 }
  0x22   : > { %329 = vadd.xlane.f32.xlu0 %v328_v10  ;;  %332 = vadd.xlane.f32.xlu1 %v331_v11 }
  0x26   : > { %335 = vadd.xlane.f32.xlu0 %v334_v14  ;;  %338 = vadd.xlane.f32.xlu1 %v337_v15 }
  0xa7   : > { %v318_v16 = vpop.xlane.xlu0 %317  ;;  %v324_v17 = vpop.xlane.xlu1 %323 }
  0xa8   : > { %v341_v18 = vmul.f32 0.03125, %v318_v16  ;;  %v343_v19 = vmul.f32 0.03125, %v324_v17 }
  0xaa   : > { %v2151_v20 = vsub.f32 %v2118_v0, %v341_v18  ;;  %v2154_v21 = vsub.f32 %v2120_v1, %v343_v19 }
  0xab   : > { %v321_v22 = vpop.xlane.xlu0 %320  ;;  %v327_v23 = vpop.xlane.xlu1 %326 }
  0xac   : > { %v342_v24 = vmul.f32 0.03125, %v321_v22  ;;  %v344_v25 = vmul.f32 0.03125, %v327_v23  ;;  %v357_v26 = vmul.f32 %v2151_v20, %v2151_v20  ;;  %v359_v27 = vmul.f32 %v2154_v21, %v2154_v21 }
  0xae   : > { %v2161_v28 = vsub.f32 %v2122_v2, %v342_v24  ;;  %v2164_v29 = vsub.f32 %v2128_v5, %v344_v25  ;;  %v365_v30 = vsel %vm315_vm0, %v357_v26, 0.0  ;;  %v371_v33 = vsel %vm315_vm0, %v359_v27, 0.0 }
  0xaf   : > { %366 = vadd.xlane.f32.xlu0 %v365_v30  ;;  %v330_v31 = vpop.xlane.xlu0 %329  ;;  %v333_v32 = vpop.xlane.xlu1 %332 }
  0xb0   : > { %v345_v34 = vmul.f32 0.03125, %v330_v31  ;;  %v346_v35 = vmul.f32 0.03125, %v333_v32  ;;  %v358_v36 = vmul.f32 %v2161_v28, %v2161_v28  ;;  %v360_v37 = vmul.f32 %v2164_v29, %v2164_v29  ;;  %v1625_v32 = vld [vmem:[%s2482_s1] ss:$0 sm:$0xff] }
  0xb2   : > { %v2173_v38 = vsub.f32 %v2134_v8, %v345_v34  ;;  %v2176_v39 = vsub.f32 %v2136_v9, %v346_v35  ;;  %v368_v40 = vsel %vm315_vm0, %v358_v36, 0.0  ;;  %v374_v43 = vsel %vm315_vm0, %v360_v37, 0.0  ;;  %v1626_v36 = vld [vmem:[%s2483_s2] ss:$0 sm:$0xff] }
  0xb3   : > { %372 = vadd.xlane.f32.xlu0 %v371_v33  ;;  %369 = vadd.xlane.f32.xlu1 %v368_v40  ;;  %v336_v41 = vpop.xlane.xlu0 %335  ;;  %v339_v42 = vpop.xlane.xlu1 %338 }
  0xb4   : > { %v347_v44 = vmul.f32 0.03125, %v336_v41  ;;  %v348_v45 = vmul.f32 0.03125, %v339_v42  ;;  %v361_v46 = vmul.f32 %v2173_v38, %v2173_v38  ;;  %v362_v47 = vmul.f32 %v2176_v39, %v2176_v39 }
  0xb6   : > { %v2185_v48 = vsub.f32 %v2142_v12, %v347_v44  ;;  %v2188_v49 = vsub.f32 %v2144_v13, %v348_v45  ;;  %v377_v50 = vsel %vm315_vm0, %v361_v46, 0.0  ;;  %v380_v51 = vsel %vm315_vm0, %v362_v47, 0.0 }
  0xb7   : > { %375 = vadd.xlane.f32.xlu1 %v374_v43  ;;  %378 = vadd.xlane.f32.xlu0 %v377_v50 }
  0xb8   : > { %v363_v52 = vmul.f32 %v2185_v48, %v2185_v48  ;;  %v364_v53 = vmul.f32 %v2188_v49, %v2188_v49 }
  0xba   : > { %v383_v54 = vsel %vm315_vm0, %v363_v52, 0.0  ;;  %v386_v55 = vsel %vm315_vm0, %v364_v53, 0.0 }
  0xbb   : > { %381 = vadd.xlane.f32.xlu1 %v380_v51  ;;  %384 = vadd.xlane.f32.xlu0 %v383_v54 }
  0xbf   : > { %387 = vadd.xlane.f32.xlu1 %v386_v55 }
 0x13c   : > { %v367_v62 = vpop.xlane.xlu0 %366 }
 0x13d   : > { %v389_v63 = vmul.f32 0.03125, %v367_v62 }
 0x13f   : > { %v397_v3 = vadd.f32 1e-05, %v389_v63 }
 0x140   : > { %v370_v4 = vpop.xlane.xlu1 %369  ;;  %v373_v6 = vpop.xlane.xlu0 %372 }
 0x141   : > { %1879 = vrsqrt.f32 %v397_v3  ;;  %v390_v7 = vmul.f32 0.03125, %v370_v4  ;;  %v391_v10 = vmul.f32 0.03125, %v373_v6 }
 0x143   : > { %v398_v11 = vadd.f32 1e-05, %v390_v7  ;;  %v399_v14 = vadd.f32 1e-05, %v391_v10  ;;  %v665_v7 = vld [vmem:[%s2486_s5 + $0x10] sm:$0xff]  ;;  %v666_v10 = vld [vmem:[%s2486_s5 + $0x18] sm:$0xff] }
 0x144   : > { %v376_v15 = vpop.xlane.xlu1 %375  ;;  %v379_v16 = vpop.xlane.xlu0 %378 }
 0x145   : > { %1881 = vrsqrt.f32 %v398_v11  ;;  %v392_v17 = vmul.f32 0.03125, %v376_v15  ;;  %v393_v18 = vmul.f32 0.03125, %v379_v16  ;;  %v803_v11 = vld [vmem:[%s2488_s7] sm:$0xff]  ;;  %v805_v15 = vld [vmem:[%s2488_s7 + $0x10] sm:$0xff] }
 0x146   : > { %1883 = vrsqrt.f32 %v399_v14  ;;  %v804_v14 = vld [vmem:[%s2488_s7 + $0x8] sm:$0xff] }
 0x147   : > { %v400_v19 = vadd.f32 1e-05, %v392_v17  ;;  %v401_v22 = vadd.f32 1e-05, %v393_v18  ;;  %v1815_v16 = vpack.c.bf16 %v804_v14, %v803_v11  ;;  %v806_v17 = vld [vmem:[%s2488_s7 + $0x18] sm:$0xff] }
 0x148   : > { %v382_v23 = vpop.xlane.xlu1 %381  ;;  %v385_v24 = vpop.xlane.xlu0 %384  ;;  %v1819_v18 = vpack.c.bf16 %v806_v17, %v805_v15 }
 0x149   : > { %1885 = vrsqrt.f32 %v400_v19  ;;  %v394_v25 = vmul.f32 0.03125, %v382_v23  ;;  %v395_v26 = vmul.f32 0.03125, %v385_v24  ;;  %1816 = vmatprep.subr.bf16.mxu0 %v1815_v16 }
 0x14a   : > { %1887 = vrsqrt.f32 %v401_v22 }
 0x14b   : > { %v1880_v27 = vpop.eup %1879  ;;  %v402_v30 = vadd.f32 1e-05, %v394_v25  ;;  %v403_v31 = vadd.f32 1e-05, %v395_v26 }
 0x14c   : > { %v388_v33 = vpop.xlane.xlu1 %387  ;;  %v413_v34 = vmul.f32 %v1880_v27, %v2151_v20 }
 0x14d   : > { %1889 = vrsqrt.f32 %v402_v30  ;;  %v396_v35 = vmul.f32 0.03125, %v388_v33 }
 0x14e   : > { %1891 = vrsqrt.f32 %v403_v31  ;;  %v428_v37 = vmul.f32 %v1625_v32, %v413_v34 }
 0x14f   : > { %v1882_v40 = vpop.eup %1881  ;;  %v404_v41 = vadd.f32 1e-05, %v396_v35 }
 0x150   : > { %v1884_v42 = vpop.eup %1883  ;;  %v443_v43 = vadd.f32 %v1626_v36, %v428_v37  ;;  %v414_v44 = vmul.f32 %v1882_v40, %v2161_v28 }
 0x151   : > { %1893 = vrsqrt.f32 %v404_v41  ;;  %v415_v45 = vmul.f32 %v1884_v42, %v2154_v21 }
 0x152   : > { %1719 = vmatprep.mubr.msk.f32.mxu0 %vm315_vm0, %v443_v43  ;;  %v429_v20 = vmul.f32 %v1625_v32, %v414_v44 }
 0x153   : > { %v1886_v46 = vpop.eup %1885  ;;  %v430_v47 = vmul.f32 %v1625_v32, %v415_v45 }
 0x154   : > { %v1888_v50 = vpop.eup %1887  ;;  %v444_v51 = vadd.f32 %v1626_v36, %v429_v20  ;;  %v416_v52 = vmul.f32 %v1886_v46, %v2164_v29 }
 0x155   : > { %v445_v53 = vadd.f32 %v1626_v36, %v430_v47  ;;  %v417_v54 = vmul.f32 %v1888_v50, %v2173_v38 }
 0x156   : > { %1720 = vmatmul.mubr.msk.f32.vlgmr.msra.gmra.mrb[0].mxu0 %vm315_vm0, %v444_v51  ;;  %v431_v55 = vmul.f32 %v1625_v32, %v416_v52 }
 0x157   : > { %v1890_v56 = vpop.eup %1889  ;;  %1722 = vmatprep.mubr.msk.f32.mxu0 %vm315_vm0, %v445_v53  ;;  %v432_v28 = vmul.f32 %v1625_v32, %v417_v54  ;;  %1818 = vmatpush3.bf16.msra.mxu0 %v1815_v16 }
 0x158   : > { %v1892_v21 = vpop.eup %1891  ;;  %v446_v57 = vadd.f32 %v1626_v36, %v431_v55  ;;  %v418_v58 = vmul.f32 %v1890_v56, %v2176_v39  ;;  %1820 = vmatprep.subr.bf16.mxu0 %v1819_v18 }
 0x159   : > { %v447_v59 = vadd.f32 %v1626_v36, %v432_v28  ;;  %v419_v60 = vmul.f32 %v1892_v21, %v2185_v48  ;;  %v663_v48 = vld [vmem:[%s2486_s5] sm:$0xff] }
 0x15a   : > { %1723 = vmatmul.mubr.msk.f32.gmra.mrb[2].mxu0 %vm315_vm0, %v446_v57  ;;  %v433_v29 = vmul.f32 %v1625_v32, %v418_v58 }
 0x15b   : > { %v1894_v61 = vpop.eup %1893  ;;  %1725 = vmatprep.mubr.msk.f32.mxu0 %vm315_vm0, %v447_v59  ;;  %v434_v38 = vmul.f32 %v1625_v32, %v419_v60  ;;  %1822 = vmatpush3.bf16.msra.mxu0 %v1819_v18 }
 0x15c   : > { %v448_v62 = vadd.f32 %v1626_v36, %v433_v29  ;;  %v420_v63 = vmul.f32 %v1894_v61, %v2188_v49  ;;  %v664_v49 = vld [vmem:[%s2486_s5 + $0x8] sm:$0xff] }
 0x15d   : > { %v449_v3 = vadd.f32 %v1626_v36, %v434_v38  ;;  %v1807_v6 = vpack.c.bf16 %v664_v49, %v663_v48 }
 0x15e   : > { %1726 = vmatmul.mubr.msk.f32.gmra.mrb[4].mxu0 %vm315_vm0, %v448_v62  ;;  %v435_v4 = vmul.f32 %v1625_v32, %v420_v63 }
 0x15f   : > { %1728 = vmatprep.mubr.msk.f32.mxu0 %vm315_vm0, %v449_v3  ;;  %1808 = vmatprep.subr.bf16.mxu1 %v1807_v6 }
 0x160   : > { %v450_v39 = vadd.f32 %v1626_v36, %v435_v4  ;;  %1810 = vmatpush3.bf16.msra.mxu1 %v1807_v6 }
 0x162   : > { %1729 = vmatmul.mubr.msk.f32.gmra.mrb[6].mxu0 %vm315_vm0, %v450_v39 }
 0x163   : > { %1759 = vmatprep.mubr.msk.f32.mxu0 %vm315_vm0, %v2118_v0  ;;  %v1811_v0 = vpack.c.bf16 %v666_v10, %v665_v7 }
 0x165   : > { %1812 = vmatprep.subr.bf16.mxu1 %v1811_v0 }
 0x166   : > { %1814 = vmatpush3.bf16.msra.mxu1 %v1811_v0  ;;  %1760 = vmatmul.mubr.msk.f32.vlgmr.msra.gmra.mrb[8].mxu0 %vm315_vm0, %v2122_v2  ;;  %v1627_v2 = vld [vmem:[%s2485_s4] ss:$0 sm:$0xff] }
 0x167   : > { %1762 = vmatprep.mubr.msk.f32.mxu0 %vm315_vm0, %v2120_v1 }
 0x16a   : > { %1763 = vmatmul.mubr.msk.f32.gmra.mrb[10].mxu0 %vm315_vm0, %v2128_v5 }
 0x16b   : > { %1765 = vmatprep.mubr.msk.f32.mxu0 %vm315_vm0, %v2134_v8 }
 0x16e   : > { %1766 = vmatmul.mubr.msk.f32.gmra.mrb[12].mxu0 %vm315_vm0, %v2136_v9 }
 0x16f   : > { %1768 = vmatprep.mubr.msk.f32.mxu0 %vm315_vm0, %v2142_v12 }
 0x172   : > { %1769 = vmatmul.mubr.msk.f32.gmra.mrb[14].mxu0 %vm315_vm0, %v2144_v13 }
 0x229   : > { %v1721_v1 = vpop.f32.mrb[0].mxu0 }
 0x22a   : > { %v2275_v19 = vadd.f32 %v1721_v1, %v1627_v2  ;;  %v552_v5 = vpop.f32.mrb[1].mxu0 }
 0x22b   : > { %v2277_v22 = vadd.f32 %v1627_v2, %v552_v5 }
 0x22c   : > { %v592_v8 = vmul.f32 %v2275_v19, %v2275_v19 }
 0x22d   : > { %v591_v9 = vmul.f32 %v2277_v22, %v2277_v22  ;;  %v1724_v12 = vpop.f32.mrb[2].mxu0 }
 0x22e   : > { %v600_v23 = vmul.f32 %v592_v8, %v2275_v19  ;;  %v2284_v13 = vadd.f32 %v1724_v12, %v1627_v2  ;;  %v562_v24 = vpop.f32.mrb[3].mxu0 }
 0x22f   : > { %v599_v25 = vmul.f32 %v591_v9, %v2277_v22  ;;  %v2287_v26 = vadd.f32 %v1627_v2, %v562_v24 }
 0x230   : > { %v608_v27 = vmul.f32 0.044715, %v600_v23  ;;  %v594_v30 = vmul.f32 %v2284_v13, %v2284_v13 }
 0x231   : > { %v607_v31 = vmul.f32 0.044715, %v599_v25  ;;  %v593_v32 = vmul.f32 %v2287_v26, %v2287_v26  ;;  %v1727_v33 = vpop.f32.mrb[4].mxu0 }
 0x232   : > { %v616_v34 = vadd.f32 %v608_v27, %v2275_v19  ;;  %v602_v35 = vmul.f32 %v594_v30, %v2284_v13  ;;  %v2295_v36 = vadd.f32 %v1727_v33, %v1627_v2  ;;  %v572_v37 = vpop.f32.mrb[5].mxu0 }
 0x233   : > { %v601_v40 = vmul.f32 %v593_v32, %v2287_v26  ;;  %v2298_v41 = vadd.f32 %v1627_v2, %v572_v37  ;;  %v615_v42 = vadd.f32 %v607_v31, %v2277_v22 }
 0x234   : > { %v624_v43 = vmul.f32 0.7978846, %v616_v34  ;;  %v610_v44 = vmul.f32 0.044715, %v602_v35  ;;  %v596_v45 = vmul.f32 %v2295_v36, %v2295_v36 }
 0x235   : > { %v609_v20 = vmul.f32 0.044715, %v601_v40  ;;  %v595_v46 = vmul.f32 %v2298_v41, %v2298_v41  ;;  %v1730_v47 = vpop.f32.mrb[6].mxu0  ;;  %v623_v50 = vmul.f32 0.7978846, %v615_v42 }
 0x236   : > { %1895 = vtanh.f32 %v624_v43  ;;  %v618_v51 = vadd.f32 %v610_v44, %v2284_v13  ;;  %v604_v52 = vmul.f32 %v596_v45, %v2295_v36  ;;  %v2307_v53 = vadd.f32 %v1730_v47, %v1627_v2  ;;  %v582_v54 = vpop.f32.mrb[7].mxu0 }
 0x237   : > { %v617_v55 = vadd.f32 %v609_v20, %v2287_v26  ;;  %v603_v56 = vmul.f32 %v595_v46, %v2298_v41  ;;  %v583_v28 = vadd.f32 %v1627_v2, %v582_v54  ;;  %1897 = vtanh.f32 %v623_v50 }
 0x238   : > { %v626_v21 = vmul.f32 0.7978846, %v618_v51  ;;  %v612_v57 = vmul.f32 0.044715, %v604_v52  ;;  %v598_v58 = vmul.f32 %v2307_v53, %v2307_v53 }
 0x239   : > { %v625_v59 = vmul.f32 0.7978846, %v617_v55  ;;  %v611_v60 = vmul.f32 0.044715, %v603_v56  ;;  %v597_v29 = vmul.f32 %v583_v28, %v583_v28  ;;  %v1761_v45 = vpop.f32.mrb[8].mxu0 }
 0x23a   : > { %1899 = vtanh.f32 %v626_v21  ;;  %v620_v61 = vadd.f32 %v612_v57, %v2295_v36  ;;  %v606_v38 = vmul.f32 %v598_v58, %v2307_v53  ;;  %v937_v20 = vmul.f32 %v1761_v45, %v1761_v45  ;;  %v897_v46 = vpop.f32.mrb[9].mxu0 }
 0x23b   : > { %1901 = vtanh.f32 %v625_v59  ;;  %v619_v62 = vadd.f32 %v611_v60, %v2298_v41  ;;  %v605_v63 = vmul.f32 %v597_v29, %v583_v28  ;;  %v936_v47 = vmul.f32 %v897_v46, %v897_v46 }
 0x23c   : > { %v628_v3 = vmul.f32 0.7978846, %v620_v61  ;;  %v614_v4 = vmul.f32 0.044715, %v606_v38  ;;  %v945_v51 = vmul.f32 %v1761_v45, %v937_v20 }
 0x23d   : > { %v627_v39 = vmul.f32 0.7978846, %v619_v62  ;;  %v613_v48 = vmul.f32 0.044715, %v605_v63  ;;  %v2335_v50 = vpop.f32.mrb[10].mxu0 }
 0x23e   : > { %1903 = vtanh.f32 %v628_v3  ;;  %v622_v49 = vadd.f32 %v614_v4, %v2307_v53  ;;  %v2337_v52 = vpop.f32.mrb[11].mxu0  ;;  %v953_v55 = vmul.f32 0.044715, %v945_v51 }
 0x23f   : > { %1905 = vtanh.f32 %v627_v39  ;;  %v621_v6 = vadd.f32 %v613_v48, %v583_v28 }
 0x240   : > { %v1896_v7 = vpop.eup %1895  ;;  %v630_v10 = vmul.f32 0.7978846, %v622_v49  ;;  %v961_v57 = vadd.f32 %v1761_v45, %v953_v55 }
 0x241   : > { %v1898_v0 = vpop.eup %1897  ;;  %v629_v11 = vmul.f32 0.7978846, %v621_v6  ;;  %v640_v14 = vadd.f32 1.0, %v1896_v7  ;;  %v2339_v54 = vpop.f32.mrb[12].mxu0 }
 0x242   : > { %1907 = vtanh.f32 %v630_v10  ;;  %v639_v15 = vadd.f32 1.0, %v1898_v0  ;;  %v2341_v56 = vpop.f32.mrb[13].mxu0  ;;  %v969_v61 = vmul.f32 0.7978846, %v961_v57 }
 0x243   : > { %1909 = vtanh.f32 %v629_v11  ;;  %v648_v16 = vmul.f32 0.5, %v640_v14 }
 0x244   : > { %v1900_v17 = vpop.eup %1899  ;;  %v647_v18 = vmul.f32 0.5, %v639_v15  ;;  %1911 = vtanh.f32 %v969_v61 }
 0x245   : > { %v1902_v2 = vpop.eup %1901  ;;  %v642_v1 = vadd.f32 1.0, %v1900_v17  ;;  %v656_v9 = vmul.f32 %v648_v16, %v2275_v19  ;;  %v1770_v21 = vpop.f32.mrb[14].mxu0 }
 0x246   : > { %v655_v5 = vmul.f32 %v647_v18, %v2277_v22  ;;  %v641_v8 = vadd.f32 1.0, %v1902_v2  ;;  %v943_v58 = vmul.f32 %v1770_v21, %v1770_v21  ;;  %v927_v59 = vpop.f32.mrb[15].mxu0 }
 0x247   : > { %v650_v12 = vmul.f32 0.5, %v642_v1  ;;  %v942_v29 = vmul.f32 %v927_v59, %v927_v59 }
 0x248   : > { %v1904_v23 = vpop.eup %1903  ;;  %1739 = vmatprep.mubr.msk.f32.mxu1 %vm315_vm0, %v655_v5  ;;  %v649_v24 = vmul.f32 0.5, %v641_v8  ;;  %v951_v38 = vmul.f32 %v1770_v21, %v943_v58 }
 0x249   : > { %v1906_v25 = vpop.eup %1905  ;;  %1740 = vmatmul.mubr.msk.f32.vlgmr.msra.gmra.mrb[0].mxu1 %vm315_vm0, %v656_v9  ;;  %v644_v27 = vadd.f32 1.0, %v1904_v23  ;;  %v658_v32 = vmul.f32 %v650_v12, %v2284_v13  ;;  %v950_v63 = vmul.f32 %v942_v29, %v927_v59 }
 0x24a   : > { %v657_v30 = vmul.f32 %v649_v24, %v2287_v26  ;;  %v643_v31 = vadd.f32 1.0, %v1906_v25  ;;  %v959_v3 = vmul.f32 0.044715, %v951_v38 }
 0x24b   : > { %v652_v33 = vmul.f32 0.5, %v644_v27  ;;  %v958_v4 = vmul.f32 0.044715, %v950_v63  ;;  %v939_v27 = vmul.f32 %v2335_v50, %v2335_v50 }
 0x24c   : > { %v1908_v34 = vpop.eup %1907  ;;  %1742 = vmatprep.mubr.msk.f32.mxu1 %vm315_vm0, %v657_v30  ;;  %v651_v22 = vmul.f32 0.5, %v643_v31  ;;  %v967_v39 = vadd.f32 %v1770_v21, %v959_v3  ;;  %v938_v30 = vmul.f32 %v2337_v52, %v2337_v52  ;;  %v941_v31 = vmul.f32 %v2339_v54, %v2339_v54 }
 0x24d   : > { %v1910_v19 = vpop.eup %1909  ;;  %1743 = vmatmul.mubr.msk.f32.gmra.mrb[2].mxu1 %vm315_vm0, %v658_v32  ;;  %v646_v35 = vadd.f32 1.0, %v1908_v34  ;;  %v660_v42 = vmul.f32 %v652_v33, %v2295_v36  ;;  %v2017_v36 = vmov 0.0   ;;  %v966_v48 = vadd.f32 %v958_v4, %v927_v59 }
 0x24e   : > { %v659_v37 = vmul.f32 %v651_v22, %v2298_v41  ;;  %v645_v40 = vadd.f32 1.0, %v1910_v19  ;;  %v2015_v41 = vmov 0.0|0.0   ;;  %v975_v49 = vmul.f32 0.7978846, %v967_v39  ;;  %v1912_v7 = vpop.eup %1911  ;;  %v1636_v22 = vld [vmem:[%s2487_s6] ss:$0 sm:$0xff] }
 0x24f   : > { %v654_v43 = vmul.f32 0.5, %v646_v35  ;;  %1823 = vmatprep.subr.bf16.mxu1 %v2015_v41  ;;  %v974_v6 = vmul.f32 0.7978846, %v966_v48  ;;  %v985_v0 = vadd.f32 1.0, %v1912_v7  ;;  %v947_v32 = vmul.f32 %v2335_v50, %v939_v27 }
 0x250   : > { %1745 = vmatprep.mubr.msk.f32.mxu1 %vm315_vm0, %v659_v37  ;;  %v653_v26 = vmul.f32 0.5, %v645_v40  ;;  %v946_v33 = vmul.f32 %v938_v30, %v2337_v52  ;;  %v940_v34 = vmul.f32 %v2341_v56, %v2341_v56  ;;  %v949_v19 = vmul.f32 %v2339_v54, %v941_v31 }
 0x251   : > { %1746 = vmatmul.mubr.msk.f32.gmra.mrb[4].mxu1 %vm315_vm0, %v660_v42  ;;  %v662_v44 = vmul.f32 %v654_v43, %v2307_v53  ;;  %v944_v53 = vmul.f32 %v936_v47, %v897_v46  ;;  %v993_v14 = vmul.f32 0.5, %v985_v0  ;;  %v955_v35 = vmul.f32 0.044715, %v947_v32 }
 0x252   : > { %v661_v13 = vmul.f32 %v653_v26, %v583_v28  ;;  %v954_v40 = vmul.f32 0.044715, %v946_v33  ;;  %v948_v42 = vmul.f32 %v940_v34, %v2341_v56 }
 0x253   : > { %v952_v28 = vmul.f32 0.044715, %v944_v53  ;;  %v1001_v16 = vmul.f32 %v1761_v45, %v993_v14  ;;  %v963_v20 = vadd.f32 %v2335_v50, %v955_v35 }
 0x254   : > { %1748 = vmatprep.mubr.msk.f32.mxu1 %vm315_vm0, %v661_v13  ;;  %v962_v51 = vadd.f32 %v954_v40, %v2337_v52  ;;  %v956_v53 = vmul.f32 0.044715, %v948_v42 }
 0x255   : > { %1749 = vmatmul.mubr.msk.f32.gmra.mrb[6].mxu1 %vm315_vm0, %v662_v44  ;;  %v960_v60 = vadd.f32 %v952_v28, %v897_v46  ;;  %v957_v44 = vmul.f32 0.044715, %v949_v19  ;;  %v971_v29 = vmul.f32 0.7978846, %v963_v20 }
 0x256   : > { %1775 = vmatprep.mubr.msk.f32.mxu1 %vm2016_vm1, %v2017_v36  ;;  %v964_v63 = vadd.f32 %v956_v53, %v2341_v56 }
 0x257   : > { %v968_v62 = vmul.f32 0.7978846, %v960_v60  ;;  %v965_v58 = vadd.f32 %v2339_v54, %v957_v44 }
 0x259   : > { %1913 = vtanh.f32 %v968_v62  ;;  %v970_v62 = vmul.f32 0.7978846, %v962_v51 }
 0x25a   : > { %1915 = vtanh.f32 %v975_v49 }
 0x25b   : > { %1917 = vtanh.f32 %v974_v6  ;;  %v973_v6 = vmul.f32 0.7978846, %v965_v58 }
 0x25c   : > { %1919 = vtanh.f32 %v971_v29 }
 0x25d   : > { %1921 = vtanh.f32 %v970_v62 }
 0x25e   : > { %1923 = vtanh.f32 %v973_v6 }
 0x263   : > { %v1914_v10 = vpop.eup %1913 }
 0x264   : > { %v984_v11 = vadd.f32 1.0, %v1914_v10  ;;  %v1916_v17 = vpop.eup %1915 }
 0x265   : > { %v1918_v2 = vpop.eup %1917  ;;  %v991_v1 = vadd.f32 1.0, %v1916_v17 }
 0x266   : > { %v992_v15 = vmul.f32 0.5, %v984_v11  ;;  %v990_v5 = vadd.f32 1.0, %v1918_v2 }
 0x267   : > { %v999_v9 = vmul.f32 0.5, %v991_v1 }
 0x268   : > { %v1000_v18 = vmul.f32 %v992_v15, %v897_v46  ;;  %v998_v12 = vmul.f32 0.5, %v990_v5  ;;  %v972_v15 = vmul.f32 0.7978846, %v964_v63 }
 0x269   : > { %v2343_v23 = vmul.f32 %v1770_v21, %v999_v9 }
 0x26a   : > { %v1824_v8 = vpack.c.bf16 %v1001_v16, %v1000_v18  ;;  %v2346_v24 = vmul.f32 %v998_v12, %v927_v59  ;;  %1925 = vtanh.f32 %v972_v15 }
 0x26c   : > { %1825 = vmatpush3.bf16.msra.mxu1 %v1824_v8  ;;  %v1833_v25 = vpack.c.bf16 %v2343_v23, %v2346_v24 }
 0x26d   : > { %1826 = vmatprep.subr.bf16.mxu1 %v2015_v41 }
 0x31c   : > { %v1741_v37 = vpop.f32.mrb[0].mxu1 }
 0x31d   : > { %v770_v43 = vadd.f32 %v1741_v37, %v1636_v22  ;;  %v764_v26 = vpop.f32.mrb[1].mxu1 }
 0x31e   : > { %v765_v13 = vadd.f32 %v1636_v22, %v764_v26 }
 0x31f   : > { %v1010_v45 = vsel %vm1008_vm2, %v770_v43, -inf }
 0x320   : > { %v1009_v46 = vsel %vm1008_vm2, %v765_v13, -inf  ;;  %v1744_v47 = vpop.f32.mrb[2].mxu1 }
 0x321   : > { %v1011_v55 = vmax.f32 %v1009_v46, %v1010_v45  ;;  %v2369_v28 = vadd.f32 %v1744_v47, %v1636_v22  ;;  %v774_v21 = vpop.f32.mrb[3].mxu1 }
 0x322   : > { %v775_v57 = vadd.f32 %v1636_v22, %v774_v21 }
 0x323   : > { %v1012_v59 = vrot.slane %v1011_v55, 4  ;;  %v1019_v60 = vsel %vm1008_vm2, %v2369_v28, -inf }
 0x324   : > { %v1018_v61 = vsel %vm1008_vm2, %v775_v57, -inf  ;;  %v1747_v38 = vpop.f32.mrb[4].mxu1 }
 0x325   : > { %v1013_v3 = vmax.f32 %v1011_v55, %v1012_v59  ;;  %v1020_v4 = vmax.f32 %v1018_v61, %v1019_v60  ;;  %v790_v39 = vadd.f32 %v1747_v38, %v1636_v22  ;;  %v784_v48 = vpop.f32.mrb[5].mxu1 }
 0x326   : > { %v785_v49 = vadd.f32 %v1636_v22, %v784_v48 }
 0x327   : > { %v1014_v7 = vrot.slane %v1013_v3, 2  ;;  %v1021_v10 = vrot.slane %v1020_v4, 4  ;;  %v1028_v0 = vsel %vm1008_vm2, %v790_v39, -inf }
 0x328   : > { %v1027_v11 = vsel %vm1008_vm2, %v785_v49, -inf  ;;  %v1750_v14 = vpop.f32.mrb[6].mxu1 }
 0x329   : > { %v1015_v16 = vmax.f32 %v1013_v3, %v1014_v7  ;;  %v1022_v17 = vmax.f32 %v1020_v4, %v1021_v10  ;;  %v1029_v18 = vmax.f32 %v1027_v11, %v1028_v0  ;;  %v2378_v2 = vadd.f32 %v1750_v14, %v1636_v22  ;;  %v794_v1 = vpop.f32.mrb[7].mxu1 }
 0x32a   : > { %v795_v5 = vadd.f32 %v1636_v22, %v794_v1  ;;  %v1920_v22 = vpop.eup %1919 }
 0x32b   : > { %v1016_v8 = vrot.slane %v1015_v16, 1  ;;  %v1023_v9 = vrot.slane %v1022_v17, 2  ;;  %v1030_v12 = vrot.slane %v1029_v18, 4  ;;  %v1037_v27 = vsel %vm1008_vm2, %v2378_v2, -inf  ;;  %v1922_v46 = vpop.eup %1921 }
 0x32c   : > { %v1036_v30 = vsel %vm1008_vm2, %v795_v5, -inf  ;;  %v1924_v21 = vpop.eup %1923  ;;  %v986_v29 = vadd.f32 1.0, %v1922_v46 }
 0x32d   : > { %v1017_v31 = vmax.f32 %v1015_v16, %v1016_v8  ;;  %v1024_v32 = vmax.f32 %v1022_v17, %v1023_v9  ;;  %v1031_v33 = vmax.f32 %v1029_v18, %v1030_v12  ;;  %v1038_v34 = vmax.f32 %v1036_v30, %v1037_v27  ;;  %v1926_v61 = vpop.eup %1925 }
 0x32e   : > { %v989_v6 = vadd.f32 1.0, %v1924_v21  ;;  %v988_v10 = vadd.f32 1.0, %v1926_v61 }
 0x32f   : > { %v1045_v19 = vsub.f32 %v765_v13, %v1017_v31  ;;  %v1046_v35 = vsub.f32 %v770_v43, %v1017_v31  ;;  %v1025_v37 = vrot.slane %v1024_v32, 1  ;;  %v1032_v40 = vrot.slane %v1031_v33, 2 }
 0x330   : > { %v1039_v42 = vrot.slane %v1038_v34, 4  ;;  %v987_v13 = vadd.f32 1.0, %v1920_v22  ;;  %v996_v8 = vmul.f32 0.5, %v988_v10 }
 0x331   : > { %v1053_v26 = vmul.f32 1.442695, %v1045_v19  ;;  %v1055_v44 = vmul.f32 1.442695, %v1046_v35  ;;  %v1026_v45 = vmax.f32 %v1024_v32, %v1025_v37  ;;  %v1033_v20 = vmax.f32 %v1031_v33, %v1032_v40 }
 0x332   : > { %v1040_v47 = vmax.f32 %v1038_v34, %v1039_v42  ;;  %v995_v4 = vmul.f32 0.5, %v987_v13  ;;  %v2398_v30 = vmul.f32 %v996_v8, %v2341_v56 }
 0x333   : > { %1927 = vpow2.f32 %v1053_v26  ;;  %v1047_v51 = vsub.f32 %v775_v57, %v1026_v45  ;;  %v1048_v53 = vsub.f32 %v2369_v28, %v1026_v45  ;;  %v1034_v55 = vrot.slane %v1033_v20, 1 }
 0x334   : > { %1929 = vpow2.f32 %v1055_v44  ;;  %v1041_v58 = vrot.slane %v1040_v47, 2  ;;  %v994_v28 = vmul.f32 0.5, %v986_v29  ;;  %v2386_v15 = vmul.f32 %v2335_v50, %v995_v4 }
 0x335   : > { %v1057_v43 = vmul.f32 1.442695, %v1047_v51  ;;  %v1059_v59 = vmul.f32 1.442695, %v1048_v53  ;;  %v1035_v60 = vmax.f32 %v1033_v20, %v1034_v55 }
 0x336   : > { %v1042_v38 = vmax.f32 %v1040_v47, %v1041_v58 }
 0x337   : > { %1931 = vpow2.f32 %v1057_v43  ;;  %v1049_v62 = vsub.f32 %v785_v49, %v1035_v60  ;;  %v1050_v63 = vsub.f32 %v790_v39, %v1035_v60  ;;  %v2389_v39 = vmul.f32 %v994_v28, %v2337_v52 }
 0x338   : > { %1933 = vpow2.f32 %v1059_v59  ;;  %v1043_v3 = vrot.slane %v1042_v38, 1  ;;  %v997_v49 = vmul.f32 0.5, %v989_v6 }
 0x339   : > { %v1061_v57 = vmul.f32 1.442695, %v1049_v62  ;;  %v1063_v48 = vmul.f32 1.442695, %v1050_v63  ;;  %v1827_v31 = vpack.c.bf16 %v2386_v15, %v2389_v39 }
 0x33a   : > { %v1044_v7 = vmax.f32 %v1042_v38, %v1043_v3 }
 0x33b   : > { %1935 = vpow2.f32 %v1061_v57 }
 0x33c   : > { %1937 = vpow2.f32 %v1063_v48  ;;  %v1051_v0 = vsub.f32 %v795_v5, %v1044_v7  ;;  %v1052_v11 = vsub.f32 %v2378_v2, %v1044_v7  ;;  %v2394_v2 = vmul.f32 %v2339_v54, %v997_v49 }
 0x33d   : > { %v1928_v14 = vpop.eup %1927 }
 0x33e   : > { %v1930_v16 = vpop.eup %1929  ;;  %v1069_v17 = vsel %vm1008_vm2, %v1928_v14, 0.0  ;;  %v1065_v18 = vmul.f32 1.442695, %v1051_v0  ;;  %v1067_v1 = vmul.f32 1.442695, %v1052_v11  ;;  %v1830_v42 = vpack.c.bf16 %v2394_v2, %v2398_v30 }
 0x33f   : > { %v1070_v9 = vsel %vm1008_vm2, %v1930_v16, 0.0 }
 0x340   : > { %v1071_v12 = vadd.f32 %v1070_v9, %v1069_v17  ;;  %1939 = vpow2.f32 %v1065_v18 }
 0x341   : > { %v1932_v5 = vpop.eup %1931  ;;  %1941 = vpow2.f32 %v1067_v1 }
 0x342   : > { %v1934_v50 = vpop.eup %1933  ;;  %v1072_v27 = vrot.slane %v1071_v12, 4  ;;  %v1078_v52 = vsel %vm1008_vm2, %v1932_v5, 0.0 }
 0x343   : > { %v1079_v32 = vsel %vm1008_vm2, %v1934_v50, 0.0 }
 0x344   : > { %v1080_v33 = vadd.f32 %v1079_v32, %v1078_v52  ;;  %v1073_v34 = vadd.f32 %v1072_v27, %v1071_v12 }
 0x345   : > { %v1936_v19 = vpop.eup %1935 }
 0x346   : > { %v1938_v35 = vpop.eup %1937  ;;  %v1081_v37 = vrot.slane %v1080_v33, 4  ;;  %v1087_v54 = vsel %vm1008_vm2, %v1936_v19, 0.0  ;;  %v1074_v40 = vrot.slane %v1073_v34, 2 }
 0x347   : > { %v1088_v22 = vsel %vm1008_vm2, %v1938_v35, 0.0 }
 0x348   : > { %v1089_v56 = vadd.f32 %v1088_v22, %v1087_v54  ;;  %v1075_v26 = vadd.f32 %v1074_v40, %v1073_v34  ;;  %v1082_v44 = vadd.f32 %v1081_v37, %v1080_v33 }
 0x34a   : > { %v1940_v45 = vpop.eup %1939  ;;  %v1090_v20 = vrot.slane %v1089_v56, 4  ;;  %v1076_v46 = vrot.slane %v1075_v26, 1  ;;  %v1083_v47 = vrot.slane %v1082_v44, 2 }
 0x34b   : > { %v1942_v51 = vpop.eup %1941  ;;  %v1096_v53 = vsel %vm1008_vm2, %v1940_v45, 0.0 }
 0x34c   : > { %v1097_v55 = vsel %vm1008_vm2, %v1942_v51, 0.0  ;;  %v1077_v21 = vadd.f32 %v1076_v46, %v1075_v26  ;;  %v1084_v58 = vadd.f32 %v1083_v47, %v1082_v44  ;;  %v1091_v13 = vadd.f32 %v1090_v20, %v1089_v56 }
 0x34d   : > { %v1098_v43 = vadd.f32 %v1097_v55, %v1096_v53 }
 0x34e   : > { %1943 = vrcp.f32 %v1077_v21  ;;  %v1085_v59 = vrot.slane %v1084_v58, 1  ;;  %v1092_v60 = vrot.slane %v1091_v13, 2 }
 0x34f   : > { %v1099_v29 = vrot.slane %v1098_v43, 4 }
 0x350   : > { %v1086_v61 = vadd.f32 %v1085_v59, %v1084_v58  ;;  %v1093_v38 = vadd.f32 %v1092_v60, %v1091_v13 }
 0x351   : > { %v1100_v62 = vadd.f32 %v1099_v29, %v1098_v43 }
 0x352   : > { %1945 = vrcp.f32 %v1086_v61  ;;  %v1094_v63 = vrot.slane %v1093_v38, 1 }
 0x353   : > { %v1101_v3 = vrot.slane %v1100_v62, 2 }
 0x354   : > { %v1095_v4 = vadd.f32 %v1094_v63, %v1093_v38 }
 0x355   : > { %v1102_v57 = vadd.f32 %v1101_v3, %v1100_v62 }
 0x356   : > { %1947 = vrcp.f32 %v1095_v4 }
 0x357   : > { %v1103_v48 = vrot.slane %v1102_v57, 1 }
 0x358   : > { %v1944_v28 = vpop.eup %1943 }
 0x359   : > { %v1109_v6 = vmul.f32 %v1944_v28, %v1928_v14  ;;  %v1110_v7 = vmul.f32 %v1944_v28, %v1930_v16  ;;  %v1104_v10 = vadd.f32 %v1103_v48, %v1102_v57 }
 0x35b   : > { %1117 = vxpose.xlu0.b32.start [1/2] (short) (narrow) %v1109_v6, 8  ;;  %1949 = vrcp.f32 %v1104_v10 }
 0x35c   : > { %v1946_v0 = vpop.eup %1945 }
 0x35d   : > { %v1111_v11 = vmul.f32 %v1946_v0, %v1932_v5  ;;  %v1112_v49 = vmul.f32 %v1946_v0, %v1934_v50 }
 0x35f   : > { %1118 = vxpose.xlu0.b32.end [2/2] (short) (narrow) %v1110_v7, 8  ;;  %1223 = vxpose.xlu1.b32.start [1/2] (short) (narrow) %v1111_v11, 8 }
 0x360   : > { %v1948_v17 = vpop.eup %1947 }
 0x361   : > { %v1113_v18 = vmul.f32 %v1948_v17, %v1936_v19  ;;  %v1114_v1 = vmul.f32 %v1948_v17, %v1938_v35 }
 0x363   : > { %1224 = vxpose.xlu1.b32.end [2/2] (short) (narrow) %v1112_v49, 8  ;;  %1328 = vxpose.xlu0.b32.start [1/2] (short) (narrow) %v1113_v18, 8 }
 0x365   : > { %v1950_v8 = vpop.eup %1949 }
 0x366   : > { %v1115_v9 = vmul.f32 %v1950_v8, %v1940_v45  ;;  %v1116_v12 = vmul.f32 %v1950_v8, %v1942_v51 }
 0x367   : > { %1329 = vxpose.xlu0.b32.end [2/2] (short) (narrow) %v1114_v1, 8 }
 0x368   : > { %1433 = vxpose.xlu1.b32.start [1/2] (short) (narrow) %v1115_v9, 8 }
 0x36c   : > { %1434 = vxpose.xlu1.b32.end [2/2] (short) (narrow) %v1116_v12, 8 }
 0x3db   : > { %v1133_v14 = vpop.trf.xlu0 }
 0x3dc   : > { %1776 = vmatmul.mubr.msk.f32.vlgmr.msra.gmra.mrb[8].mxu1 %vm1149_vm3, %v1133_v14 }
 0x3dd   : > { %1828 = vmatpush3.bf16.msra.mxu1 %v1827_v31  ;;  %1782 = vmatprep.mubr.msk.f32.mxu1 %vm2016_vm1, %v2017_v36 }
 0x3de   : > { %1829 = vmatprep.subr.bf16.mxu1 %v2015_v41 }
 0x3df   : > { %v1239_v16 = vpop.trf.xlu1 }
 0x3e0   : > { %1783 = vmatmul.mubr.msk.f32.vlgmr.msra.gmra.mrb[10].mxu1 %vm1149_vm3, %v1239_v16 }
 0x3e1   : > { %1831 = vmatpush3.bf16.msra.mxu1 %v1830_v42  ;;  %1789 = vmatprep.mubr.msk.f32.mxu1 %vm2016_vm1, %v2017_v36 }
 0x3e2   : > { %1832 = vmatprep.subr.bf16.mxu1 %v2015_v41 }
 0x3e3   : > { %v1344_v5 = vpop.trf.xlu0 }
 0x3e4   : > { %1790 = vmatmul.mubr.msk.f32.vlgmr.msra.gmra.mrb[12].mxu1 %vm1149_vm3, %v1344_v5 }
 0x3e5   : > { %1834 = vmatpush3.bf16.msra.mxu1 %v1833_v25  ;;  %1796 = vmatprep.mubr.msk.f32.mxu1 %vm2016_vm1, %v2017_v36 }
 0x3e8   : > { %v1449_v15 = vpop.trf.xlu1 }
 0x3e9   : > { %1797 = vmatmul.mubr.msk.f32.vlgmr.msra.gmra.mrb[14].mxu1 %vm1149_vm3, %v1449_v15 }
 0x4af   : > { %v1219_v39 = vpop.f32.mrb[8].mxu1 }
 0x4b0   : > { %1538 = vst.msk [vmem:[%s299_s17] sm:$0xff] %vm315_vm0, %v1219_v39  ;;  %v1777_v41 = vpop.f32.mrb[9].mxu1 }
 0x4b3   : > { %v1324_v2 = vpop.f32.mrb[10].mxu1 }
 0x4b4   : > { %1539 = vst.msk [vmem:[%s299_s17 + $0x8] sm:$0xff] %vm315_vm0, %v1324_v2  ;;  %v1784_v23 = vpop.f32.mrb[11].mxu1 }
 0x4b7   : > { %v1429_v24 = vpop.f32.mrb[12].mxu1 }
 0x4b8   : > { %1540 = vst.msk [vmem:[%s299_s17 + $0x10] sm:$0xff] %vm315_vm0, %v1429_v24  ;;  %v1791_v36 = vpop.f32.mrb[13].mxu1 }
 0x4bc   : > { %v1534_v25 = vpop.f32.mrb[14].mxu1 }
 0x4bd   : > { %1541 = vst.msk [vmem:[%s299_s17 + $0x18] sm:$0xff] %vm315_vm0, %v1534_v25  ;;  %v1798_v50 = vpop.f32.mrb[15].mxu1 }
 0x4be   : > { %1964 = shalt.err (!%p1961_p3)
}
 0x4bf   : > { %s1965_s10 = scalar_lea.hbm %s2437_s22, 512  ;;  %s1969_s17 = scalar_lea.hbm %s2489_s8, 1024 }
 0x4c0   : > { %p1966_p4 = scmp.ne.s32.totalorder %s2437_s22, %s1965_s10  ;;  %p1970_p9 = scmp.lt.u32.totalorder %s2437_s22, %s2489_s8 }
 0x4c1   : > { %p1971_p10 = scmp.lt.u32.totalorder %s1969_s17, %s1965_s10  ;;  %p1973_p12 = scmp.lt.u32.totalorder %s1965_s10, %s2437_s22 }
 0x4c2   : > { %p1967_p7 = pnand %p1966_p4, %p2104_p5 }
 0x4c3   : > { %p1972_p11 = por %p1971_p10, %p1970_p9 }
 0x4c4   : > { %p1968_p8 = pneg %p1967_p7 }
 0x4c5   : > { %p1974_p13 = por %p1973_p12, %p1972_p11 }
 0x4c7   : > { %p1975_p0 = pnand %p1974_p13, %p1968_p8 }
 0x4c9   : > { %1978 = shalt.err (!%p1975_p0)
}
 0x4ca   : > { %s2019_s21 = smov 128   ;;  %s2020_s9 = smov 8  }
 0x4cb   : > { %1835 = dma.vmem_to_hbm [thread:$0]  (%p2104_p5), %s2432_s18, 512, %s2437_s22, %s2440_s23, %s2019_s21, %s2019_s21, %s2020_s9  }
 0x4cc PF: > { %p1841_p1 = scmp.ge.s32.totalorder %s2013_s30, 2  ;;  %s1571_s24 = sand.u32 1, %s2001_s27  }
 0x4cd   : > { %s1572_s25 = scalar_lea.sflag [#allocation3], %s1571_s24 }
 0x4ce   : > { %p1838_p2 = pnand %p1841_p1, %p2108_p6 }
 0x4d0   : > { %1996 = dma.done.wait (!%p1838_p2), %s1572_s25, 512  }
 0x4d1   : > { %1998 = vsyncadd (!%p1838_p2), %s1572_s25, 4294966784  ;;  %p18_p3 = scmp.ge.s32.totalorder %s2091_s11, 4   ;;  %s2492_s27 = smov %s2005_s28 }
 0x4d2   : > { %s2493_s28 = smov %s2009_s29  ;;  %s2494_s29 = smov %s2102_s14 }
 0x4d3   : > { %s2495_s30 = smov %s2091_s11  ;;  %20 = sbr.rel (!%p18_p3) target bundleno = 3 (0x3), region = 87 }
 0x4da   :  { %1577 = vsyncpa [#allocation3], 1 }
 0x4db   :  { %1579 = vsyncpa [#allocation3 + $0x1], 1 }

</bundles_post_ra>
